<compile_context>
chip_gen: v6e
topology: v6e:2x2x1
jax: 0.10.0
libtpu: 0.0.40
codegen_flags: <defaults>
</compile_context>

<pallas_src>
import functools

import jax
import jax.numpy as jnp
from jax import lax
from jax.experimental import pallas as pl
from jax.experimental.pallas import tpu as pltpu


def _round_up(x: int, m: int) -> int:
    return ((x + m - 1) // m) * m


def _cdiv(a: int, b: int) -> int:
    return -(-a // b)


def _softplus(v):
    # Matches torch.nn.functional.softplus(beta=1, threshold=20):
    # identity above the threshold, log1p(exp(v)) below (numerically safe).
    return jnp.where(v > 20.0, v, jnp.log1p(jnp.exp(jnp.minimum(v, 20.0))))


def _vae_encoder_kernel(x_ref, w1_ref, b1_ref, wh_ref, bh_ref, out_ref, *, lf, hp):
    """grid = (batch tiles [parallel], nef chunks [arbitrary]).

    The output block index is constant across the nef-chunk axis, so the f32
    output block stays VMEM-resident and doubles as the head accumulator.
    """
    k = pl.program_id(1)

    # Hidden chunk: cast x to the MXU dtype in-kernel (x streams from HBM once
    # in f32), f32 accumulation on the MXU, bias + ReLU on the VPU.
    xb = x_ref[...].astype(w1_ref.dtype)
    h = jnp.dot(xb, w1_ref[...], preferred_element_type=jnp.float32)
    h = jnp.maximum(h + b1_ref[...], 0.0)

    # Fused [mean | var_pre | pad] head contribution for this nef chunk.
    part = jnp.dot(h.astype(wh_ref.dtype), wh_ref[...],
                   preferred_element_type=jnp.float32)

    @pl.when(k == 0)
    def _():
        out_ref[...] = part

    @pl.when(k != 0)
    def _():
        out_ref[...] = out_ref[...] + part

    # Finalize on the last nef chunk: head bias, then softplus on the var
    # lanes [lf, 2*lf) selected by a (1, hp) lane mask (broadcast in where).
    @pl.when(k == pl.num_programs(1) - 1)
    def _():
        z = out_ref[...] + bh_ref[...]
        col = lax.broadcasted_iota(jnp.int32, (1, hp), 1)
        is_var = (col >= lf) & (col < 2 * lf)
        out_ref[...] = jnp.where(is_var, _softplus(z), z).astype(out_ref.dtype)


def prepack_params(params, *, use_bf16=True, nef_chunk=512, max_single_chunk=1024):
    """One-time packing/padding of the weights (do NOT call per forward).

    Returns (packed_arrays, meta). Zero padding is numerically exact:
    padded w1 columns / b1 entries give h == relu(0) == 0, and padded wh rows
    are zero, so pad lanes never contribute to the head accumulation.
    """
    in_ftr, nef = params["w1"].shape
    lf = params["wm"].shape[1]
    cdt = jnp.bfloat16 if use_bf16 else jnp.float32
    wbytes = 2 if use_bf16 else 4

    nef_p = _round_up(nef, 128)
    if nef_p > max_single_chunk:
        nef_p = _round_up(nef_p, nef_chunk)
        nc = nef_chunk
    else:
        nc = nef_p
    hp = max(_round_up(2 * lf, 128), 128)   # fused head width (lane-dense)

    w1p = jnp.zeros((in_ftr, nef_p), cdt).at[:, :nef].set(params["w1"].astype(cdt))
    b1p = jnp.zeros((1, nef_p), jnp.float32).at[:, :nef].set(params["b1"])
    whp = (jnp.zeros((nef_p, hp), cdt)
           .at[:nef, :lf].set(params["wm"].astype(cdt))
           .at[:nef, lf:2 * lf].set(params["wv"].astype(cdt)))
    bhp = (jnp.zeros((1, hp), jnp.float32)
           .at[:, :lf].set(params["bm"])
           .at[:, lf:2 * lf].set(params["bv"]))

    packed = {"w1": w1p, "b1": b1p, "wh": whp, "bh": bhp}
    meta = dict(in_ftr=in_ftr, nef=nef, lf=lf, nef_p=nef_p, nc=nc, hp=hp,
                wbytes=wbytes)
    return packed, meta


def _vmem_budget_bytes() -> int:
    # Generation-aware budget: v5e/v6e have 128 MiB physical VMEM per
    # TensorCore, v7x only 64 MiB. Leave headroom for Mosaic internals.
    try:
        cap = pltpu.get_tpu_info().vmem_capacity_bytes
    except Exception:
        cap = 64 * 1024 * 1024
    return min(int(cap * 3 // 4), 96 * 1024 * 1024)


def variational_encoder_forward(x, packed, meta, *, block_b=512):
    """x: (B, in_ftr) float32; packed/meta from prepack_params.

    Returns (mean, var), each (B, lf) float32.
    """
    B, in_ftr = x.shape
    assert in_ftr == meta["in_ftr"]
    lf, nef_p, nc, hp = meta["lf"], meta["nef_p"], meta["nc"], meta["hp"]
    wbytes = meta["wbytes"]

    # Pad batch rows only to a sublane multiple (<= 7 rows); feature dim is
    # handled un-padded (Mosaic pads the contraction internally).
    B_pad = _round_up(B, 8)
    if B_pad != B:
        x = jnp.zeros((B_pad, in_ftr), x.dtype).at[:B].set(x)

    # Equal-sized batch tiles; >= 2 tiles when the batch allows, so the
    # "parallel" axis can shard across v7x's 2 TensorCores (no-op on v5e/v6e).
    n_tiles = max(1, _cdiv(B_pad, block_b))
    if B_pad >= 64:
        n_tiles = max(n_tiles, 2)
    TB = _round_up(_cdiv(B_pad, n_tiles), 8)

    budget = _vmem_budget_bytes()

    def vmem_estimate(tb):
        dbl = 2                                       # double-buffered streams
        x_b = tb * in_ftr * 4 * dbl
        w1_b = in_ftr * nc * wbytes * dbl
        b1_b = 8 * nc * 4 * dbl
        wh_b = nc * hp * wbytes * dbl
        bh_b = 8 * hp * 4 * dbl
        out_b = tb * hp * 4 * dbl
        interm = tb * nc * (4 + wbytes) + tb * in_ftr * wbytes   # h + casts
        return x_b + w1_b + b1_b + wh_b + bh_b + out_b + interm

    while TB > 64 and vmem_estimate(TB) > budget:
        TB = _round_up(TB // 2, 8)

    grid_b = _cdiv(B_pad, TB)            # last tile may be partial (clamped)
    n_k = nef_p // nc
    vmem_limit = int(min(budget, max(2 * vmem_estimate(TB), 32 * 1024 * 1024)))

    kernel = functools.partial(_vae_encoder_kernel, lf=lf, hp=hp)

    out = pl.pallas_call(
        kernel,
        out_shape=jax.ShapeDtypeStruct((B_pad, hp), jnp.float32),
        grid_spec=pltpu.PrefetchScalarGridSpec(
            num_scalar_prefetch=0,
            grid=(grid_b, n_k),
            in_specs=[
                pl.BlockSpec((TB, in_ftr), lambda i, k: (i, 0)),   # x (f32)
                pl.BlockSpec((in_ftr, nc), lambda i, k: (0, k)),   # w1 chunk
                pl.BlockSpec((1, nc), lambda i, k: (0, k)),        # b1 chunk
                pl.BlockSpec((nc, hp), lambda i, k: (k, 0)),       # wm|wv chunk
                pl.BlockSpec((1, hp), lambda i, k: (0, 0)),        # bm|bv
            ],
            out_specs=pl.BlockSpec((TB, hp), lambda i, k: (i, 0)), # packed out
        ),
        compiler_params=pltpu.CompilerParams(
            dimension_semantics=("parallel", "arbitrary"),
            vmem_limit_bytes=vmem_limit,
        ),
    )(x, packed["w1"], packed["b1"], packed["wh"], packed["bh"])

    z = out[:B, :2 * lf]                 # single slice of the packed output
    return z[:, :lf], z[:, lf:]


def init_params(key, in_ftr, nef, lf):
    """Deterministic PyTorch-style init; weights stored pre-transposed (in, out)."""
    ks = jax.random.split(key, 6)

    def linear(kw, kb, fan_in, fan_out):
        bound = 1.0 / jnp.sqrt(jnp.float32(fan_in))
        w = jax.random.uniform(kw, (fan_in, fan_out), jnp.float32, -bound, bound)
        b = jax.random.uniform(kb, (1, fan_out), jnp.float32, -bound, bound)
        return w, b

    w1, b1 = linear(ks[0], ks[1], in_ftr, nef)
    wm, bm = linear(ks[2], ks[3], nef, lf)
    wv, bv = linear(ks[4], ks[5], nef, lf)
    return {"w1": w1, "b1": b1, "wm": wm, "bm": bm, "wv": wv, "bv": bv}


def reference_forward(x, p, compute_dtype=jnp.float32):
    """Pure-JAX reference mirroring the kernel's precision policy."""
    xd = x.astype(compute_dtype)
    w1 = p["w1"].astype(compute_dtype)
    wm = p["wm"].astype(compute_dtype)
    wv = p["wv"].astype(compute_dtype)
    h = jnp.maximum(
        jnp.dot(xd, w1, preferred_element_type=jnp.float32) + p["b1"], 0.0)
    hd = h.astype(compute_dtype)
    mean = jnp.dot(hd, wm, preferred_element_type=jnp.float32) + p["bm"]
    v = jnp.dot(hd, wv, preferred_element_type=jnp.float32) + p["bv"]
    return mean, _softplus(v)


if __name__ == "__main__":
    key = jax.random.PRNGKey(0)
    kx, kp, kx2, kp2 = jax.random.split(key, 4)

    # --- Case 1: small module-typical shapes, single nef chunk --------------
    B, in_ftr, nef, lf = 8, 32, 64, 16
    x = jax.random.normal(kx, (B, in_ftr), jnp.float32)
    params = init_params(kp, in_ftr, nef, lf)
    packed, meta = prepack_params(params)        # one-time prepack

    mean, var = variational_encoder_forward(x, packed, meta)
    jax.block_until_ready((mean, var))
    assert mean.shape == (B, lf) and var.shape == (B, lf)

    # Check vs. a reference using the same bf16 compute policy.
    ref_mean_bf, ref_var_bf = reference_forward(x, params, jnp.bfloat16)
    assert jnp.allclose(mean, ref_mean_bf, atol=1e-3, rtol=1e-3)
    assert jnp.allclose(var, ref_var_bf, atol=1e-3, rtol=1e-3)

    # Loose check vs. full-f32 PyTorch semantics (bf16 rounding only).
    ref_mean, ref_var = reference_forward(x, params, jnp.float32)
    assert jnp.allclose(mean, ref_mean, atol=3e-2, rtol=3e-2)
    assert jnp.allclose(var, ref_var, atol=3e-2, rtol=3e-2)
    assert bool(jnp.all(var >= 0.0)) and bool(jnp.all(jnp.isfinite(var)))

    # --- Case 2: exercises nef chunking (n_k > 1) and a partial batch tile --
    B2, in2, nef2, lf2 = 100, 200, 1536, 24
    x2 = jax.random.normal(kx2, (B2, in2), jnp.float32)
    params2 = init_params(kp2, in2, nef2, lf2)
    packed2, meta2 = prepack_params(params2)
    mean2, var2 = variational_encoder_forward(x2, packed2, meta2)
    jax.block_until_ready((mean2, var2))
    assert mean2.shape == (B2, lf2) and var2.shape == (B2, lf2)
    r_m2, r_v2 = reference_forward(x2, params2, jnp.bfloat16)
    assert jnp.allclose(mean2, r_m2, atol=5e-3, rtol=5e-3)
    assert jnp.allclose(var2, r_v2, atol=5e-3, rtol=5e-3)
    assert bool(jnp.all(jnp.isfinite(var2)))

    print("KERNEL_OK")
</pallas_src>

<mosaic_0001>
module attributes {stable_mosaic.version = 11 : i64} {
  func.func @_vae_encoder_kernel(%arg0: i32, %arg1: i32, %arg2: memref<8x32xf32, #tpu.memory_space<vmem>>, %arg3: memref<32x128xbf16, #tpu.memory_space<vmem>>, %arg4: memref<1x128xf32, #tpu.memory_space<vmem>>, %arg5: memref<128x128xbf16, #tpu.memory_space<vmem>>, %arg6: memref<1x128xf32, #tpu.memory_space<vmem>>, %arg7: memref<8x128xf32, #tpu.memory_space<vmem>>) attributes {dimension_semantics = [#tpu.dimension_semantics<parallel>, #tpu.dimension_semantics<arbitrary>], iteration_bounds = array<i64: 1, 1>, scalar_prefetch = 0 : i64, scratch_operands = 0 : i64, tpu.core_type = #tpu.core_type<tc>, window_params = [{transform_indices = @transform_0, window_bounds = array<i64: 8, 32>}, {transform_indices = @transform_1, window_bounds = array<i64: 32, 128>}, {transform_indices = @transform_2, window_bounds = array<i64: 1, 128>}, {transform_indices = @transform_3, window_bounds = array<i64: 128, 128>}, {pipeline_mode = #tpu.pipeline_mode<synchronous>, transform_indices = @transform_4, window_bounds = array<i64: 1, 128>}, {transform_indices = @transform_5, window_bounds = array<i64: 8, 128>}]} {
    %c0 = arith.constant 0 : index
    %c0_0 = arith.constant 0 : index
    %0 = vector.load %arg2[%c0, %c0_0] : memref<8x32xf32, #tpu.memory_space<vmem>>, vector<8x32xf32>
    %1 = arith.truncf %0 : vector<8x32xf32> to vector<8x32xbf16>
    %c0_1 = arith.constant 0 : index
    %c0_2 = arith.constant 0 : index
    %2 = vector.load %arg3[%c0_1, %c0_2] : memref<32x128xbf16, #tpu.memory_space<vmem>>, vector<32x128xbf16>
    %cst = arith.constant dense<0.000000e+00> : vector<8x128xf32>
    %3 = tpu.matmul %1, %2, %cst {dimension_numbers = #tpu.dot_dimension_numbers<[1], [0], [0], [1], [0, 0, 1, 1], [], []>} : vector<8x32xbf16>, vector<32x128xbf16>, vector<8x128xf32> -> vector<8x128xf32>
    %c0_3 = arith.constant 0 : index
    %c0_4 = arith.constant 0 : index
    %4 = vector.load %arg4[%c0_3, %c0_4] : memref<1x128xf32, #tpu.memory_space<vmem>>, vector<1x128xf32>
    %5 = vector.broadcast %4 : vector<1x128xf32> to vector<8x128xf32>
    %6 = arith.addf %3, %5 : vector<8x128xf32>
    %cst_5 = arith.constant 0.000000e+00 : f32
    %7 = vector.broadcast %cst_5 : f32 to vector<8x128xf32>
    %8 = arith.maximumf %6, %7 : vector<8x128xf32>
    %9 = arith.truncf %8 : vector<8x128xf32> to vector<8x128xbf16>
    %c0_6 = arith.constant 0 : index
    %c0_7 = arith.constant 0 : index
    %10 = vector.load %arg5[%c0_6, %c0_7] : memref<128x128xbf16, #tpu.memory_space<vmem>>, vector<128x128xbf16>
    %cst_8 = arith.constant dense<0.000000e+00> : vector<8x128xf32>
    %11 = tpu.matmul %9, %10, %cst_8 {dimension_numbers = #tpu.dot_dimension_numbers<[1], [0], [0], [1], [0, 0, 1, 1], [], []>} : vector<8x128xbf16>, vector<128x128xbf16>, vector<8x128xf32> -> vector<8x128xf32>
    %c0_i32 = arith.constant 0 : i32
    %12 = arith.cmpi eq, %arg1, %c0_i32 : i32
    %13 = arith.extui %12 : i1 to i32
    %c0_i32_9 = arith.constant 0 : i32
    %14 = arith.cmpi ne, %13, %c0_i32_9 : i32
    scf.if %14 {
      %c0_14 = arith.constant 0 : index
      %c0_15 = arith.constant 0 : index
      %21 = vector.load %arg7[%c0_14, %c0_15] : memref<8x128xf32, #tpu.memory_space<vmem>>, vector<8x128xf32>
      tpu.vector_store %arg7[%c0_14, %c0_15], %11 {strides = array<i32>} : memref<8x128xf32, #tpu.memory_space<vmem>>, vector<8x128xf32>,
    } else {
    }
    %c0_i32_10 = arith.constant 0 : i32
    %15 = arith.cmpi ne, %arg1, %c0_i32_10 : i32
    %16 = arith.extui %15 : i1 to i32
    %c0_i32_11 = arith.constant 0 : i32
    %17 = arith.cmpi ne, %16, %c0_i32_11 : i32
    scf.if %17 {
      %c0_14 = arith.constant 0 : index
      %c0_15 = arith.constant 0 : index
      %21 = vector.load %arg7[%c0_14, %c0_15] : memref<8x128xf32, #tpu.memory_space<vmem>>, vector<8x128xf32>
      %22 = arith.addf %21, %11 : vector<8x128xf32>
      %c0_16 = arith.constant 0 : index
      %c0_17 = arith.constant 0 : index
      %23 = vector.load %arg7[%c0_16, %c0_17] : memref<8x128xf32, #tpu.memory_space<vmem>>, vector<8x128xf32>
      tpu.vector_store %arg7[%c0_16, %c0_17], %22 {strides = array<i32>} : memref<8x128xf32, #tpu.memory_space<vmem>>, vector<8x128xf32>,
    } else {
    }
    %c0_i32_12 = arith.constant 0 : i32
    %18 = arith.cmpi eq, %arg1, %c0_i32_12 : i32
    %19 = arith.extui %18 : i1 to i32
    %c0_i32_13 = arith.constant 0 : i32
    %20 = arith.cmpi ne, %19, %c0_i32_13 : i32
    scf.if %20 {
      %c0_14 = arith.constant 0 : index
      %c0_15 = arith.constant 0 : index
      %21 = vector.load %arg7[%c0_14, %c0_15] : memref<8x128xf32, #tpu.memory_space<vmem>>, vector<8x128xf32>
      %c0_16 = arith.constant 0 : index
      %c0_17 = arith.constant 0 : index
      %22 = vector.load %arg6[%c0_16, %c0_17] : memref<1x128xf32, #tpu.memory_space<vmem>>, vector<1x128xf32>
      %23 = vector.broadcast %22 : vector<1x128xf32> to vector<8x128xf32>
      %24 = arith.addf %21, %23 : vector<8x128xf32>
      %25 = tpu.iota {dimensions = array<i32: 1>} : vector<1x128xi32>
      %c16_i32 = arith.constant 16 : i32
      %26 = vector.broadcast %c16_i32 : i32 to vector<1x128xi32>
      %27 = arith.cmpi sge, %25, %26 : vector<1x128xi32>
      %c32_i32 = arith.constant 32 : i32
      %28 = vector.broadcast %c32_i32 : i32 to vector<1x128xi32>
      %29 = arith.cmpi slt, %25, %28 : vector<1x128xi32>
      %30 = arith.andi %27, %29 : vector<1x128xi1>
      %cst_18 = arith.constant 2.000000e+01 : f32
      %31 = vector.broadcast %cst_18 : f32 to vector<8x128xf32>
      %32 = arith.cmpf ogt, %24, %31 : vector<8x128xf32>
      %cst_19 = arith.constant 2.000000e+01 : f32
      %33 = vector.broadcast %cst_19 : f32 to vector<8x128xf32>
      %34 = arith.minimumf %24, %33 : vector<8x128xf32>
      %35 = math.exp %34 : vector<8x128xf32>
      %36 = math.log1p %35 : vector<8x128xf32>
      %37 = arith.select %32, %24, %36 : vector<8x128xi1>, vector<8x128xf32>
      %38 = vector.shape_cast %30 : vector<1x128xi1> to vector<1x128xi1>
      %39 = vector.broadcast %38 : vector<1x128xi1> to vector<8x128xi1>
      %40 = arith.select %39, %37, %24 : vector<8x128xi1>, vector<8x128xf32>
      %c0_20 = arith.constant 0 : index
      %c0_21 = arith.constant 0 : index
      %41 = vector.load %arg7[%c0_20, %c0_21] : memref<8x128xf32, #tpu.memory_space<vmem>>, vector<8x128xf32>
      tpu.vector_store %arg7[%c0_20, %c0_21], %40 {strides = array<i32>} : memref<8x128xf32, #tpu.memory_space<vmem>>, vector<8x128xf32>,
    } else {
    }
    return
  }
  func.func @transform_0(%arg0: i32, %arg1: i32) -> (i32, i32) {
    %c0_i32 = arith.constant 0 : i32
    %c0_i32_0 = arith.constant 0 : i32
    return %arg0, %c0_i32 : i32, i32
  }
  func.func @transform_1(%arg0: i32, %arg1: i32) -> (i32, i32) {
    %c0_i32 = arith.constant 0 : i32
    %c0_i32_0 = arith.constant 0 : i32
    return %c0_i32, %arg1 : i32, i32
  }
  func.func @transform_2(%arg0: i32, %arg1: i32) -> (i32, i32) {
    %c0_i32 = arith.constant 0 : i32
    %c0_i32_0 = arith.constant 0 : i32
    return %c0_i32, %arg1 : i32, i32
  }
  func.func @transform_3(%arg0: i32, %arg1: i32) -> (i32, i32) {
    %c0_i32 = arith.constant 0 : i32
    %c0_i32_0 = arith.constant 0 : i32
    return %arg1, %c0_i32 : i32, i32
  }
  func.func @transform_4(%arg0: i32, %arg1: i32) -> (i32, i32) {
    %c0_i32 = arith.constant 0 : i32
    %c0_i32_0 = arith.constant 0 : i32
    %c0_i32_1 = arith.constant 0 : i32
    return %c0_i32, %c0_i32_0 : i32, i32
  }
  func.func @transform_5(%arg0: i32, %arg1: i32) -> (i32, i32) {
    %c0_i32 = arith.constant 0 : i32
    %c0_i32_0 = arith.constant 0 : i32
    return %arg0, %c0_i32 : i32, i32
  }
}

</mosaic_0001>

<bundles_post_ra>
// kernel: tpu_custom_call.1
= control target key start
LH: loop header
LB: loop body
LE: loop exit
PB: predicated region body
PF: predicated region fallthrough
CT: control target
= control target key end

     0   :  { %10 = vsyncpa [#allocation3], 0  ;;  %s516_s0 = inlined_call_operand.hbm [shape: f32[8,32], index: 0, kind: input, shape index: {}]   ;;  %s517_s1 = inlined_call_operand.hbm [shape: bf16[32,128], index: 1, kind: input, shape index: {}]   ;;  %s518_s2 = inlined_call_operand.vmem [shape: f32[1,128], index: 2, kind: input, shape index: {}]   ;;  %s519_s3 = inlined_call_operand.hbm [shape: bf16[128,128], index: 3, kind: input, shape index: {}]   ;;  %s520_s4 = inlined_call_operand.vmem [shape: f32[1,128], index: 4, kind: input, shape index: {}]   ;;  %s521_s5 = inlined_call_operand.hbm [shape: f32[8,128], index: 5, kind: output, shape index: {}]  }
   0x1   :  { %11 = vsyncpa [#allocation6], 0 }
   0x2   :  { %12 = vsyncpa [#allocation4], 0  ;;  %s460_s18 = smov [#allocation5]  }
   0x3   :  { %s28_s19 = sshll.u32 %s460_s18, 4  ;;  %s29_s19 = int_to_ptr.vmem [resolvable:$true] %s28_s19 }
   0x4   :  { %s382_s20 = scalar_lea.vmem %s29_s19, 256  ;;  %p387_p1 = scmp.lt.s32.totalorder %s29_s19, %s29_s19 }
   0x5   :  { %p383_p0 = scmp.ne.s32.totalorder %s29_s19, %s382_s20  ;;  %p388_p2 = scmp.lt.s32.totalorder %s382_s20, %s382_s20 }
   0x7   :  { %p389_p3 = por %p388_p2, %p387_p1 }
   0x9   :  { %p390_p4 = pnand %p389_p3, %p383_p0 }
   0xb   :  { %393 = shalt.err (!%p390_p4)
}
   0xc   :  { %s461_s21 = smov 64   ;;  %s462_s22 = smov 4  }
   0xd   :  { %34 = dma.hbm_to_vmem [thread:$0]  %s517_s1, 256, %s29_s19, [#allocation6], %s461_s21, %s461_s21, %s462_s22  }
   0xe   :  { %s463_s25 = smov [#allocation2]   ;;  %s464_s27 = smov [#allocation7]  }
   0xf   :  { %s19_s26 = sshll.u32 %s463_s25, 4  ;;  %s42_s28 = sshll.u32 %s464_s27, 4  ;;  %s20_s26 = int_to_ptr.vmem [resolvable:$true] %s19_s26  ;;  %s43_s28 = int_to_ptr.vmem [resolvable:$true] %s42_s28 }
  0x10   :  { %s402_s29 = scalar_lea.vmem %s20_s26, 128  ;;  %p407_p6 = scmp.lt.s32.totalorder %s20_s26, %s20_s26 }
  0x11   :  { %p403_p5 = scmp.ne.s32.totalorder %s20_s26, %s402_s29  ;;  %p408_p7 = scmp.lt.s32.totalorder %s402_s29, %s402_s29 }
  0x13   :  { %p409_p8 = por %p408_p7, %p407_p6 }
  0x15   :  { %p410_p9 = pnand %p409_p8, %p403_p5 }
  0x17   :  { %413 = shalt.err (!%p410_p9)
}
  0x18   :  { %22 = dma.hbm_to_vmem [thread:$0]  %s516_s0, 128, %s20_s26, [#allocation3]  }
  0x19   :  { %s422_s7 = scalar_lea.vmem %s43_s28, 1024  ;;  %p427_p11 = scmp.lt.s32.totalorder %s43_s28, %s43_s28 }
  0x1a   :  { %p423_p10 = scmp.ne.s32.totalorder %s43_s28, %s422_s7  ;;  %p428_p12 = scmp.lt.s32.totalorder %s422_s7, %s422_s7 }
  0x1c   :  { %p429_p13 = por %p428_p12, %p427_p11 }
  0x1e   :  { %p430_p0 = pnand %p429_p13, %p423_p10 }
  0x20   :  { %433 = shalt.err (!%p430_p0)
}
  0x21   :  { %48 = dma.hbm_to_vmem [thread:$0]  %s519_s3, 1024, %s43_s28, [#allocation6], %s461_s21, %s461_s21, %s462_s22  }
  0x22   :  { %454 = dma.done.wait [#allocation3], 128  }
  0x23   :  { %455 = vsyncadd [#allocation3], 4294967168 }
  0x24   :  { %456 = dma.done.wait [#allocation6], 1280  }
  0x25   :  { %457 = vsyncadd [#allocation6], 4294966016  ;;  %v465_v0 = vmov 0.0   ;;  %vm466_vm0 = vmmov 0   ;;  %v360_v1 = vld [vmem:[#allocation5 + $0x8] sm:$0xff]   ;;  %v361_v2 = vld [vmem:[#allocation5] sm:$0xff]   ;;  %v260_v31 = vlaneseq }
  0x26   :  { %324 = vmatprep.subr.bf16.mxu0 %v465_v0  ;;  %328 = vmatprep.mubr.msk.bf16.mxu0 %vm466_vm0, %v465_v0  ;;  %v61_v3 = vld [vmem:[#allocation2] sm:$0xff]  ;;  %v362_v4 = vld [vmem:[#allocation7 + $0x38] sm:$0xff]   ;;  %v363_v6 = vld [vmem:[#allocation7 + $0x30] sm:$0xff]   ;;  %vm86_vm1 = vcmask 261120  }
  0x27   :  { %332 = vmatprep.subr.bf16.mxu1 %v465_v0  ;;  %348 = vmatprep.mubr.msk.bf16.mxu1 %vm466_vm0, %v465_v0  ;;  %v62_v5 = vpack.c.bf16 %v61_v3, %v61_v3  ;;  %v364_v7 = vld [vmem:[#allocation7 + $0x28] sm:$0xff]   ;;  %v365_v8 = vld [vmem:[#allocation7 + $0x20] sm:$0xff]   ;;  %v366_v9 = vld [vmem:[#allocation7 + $0x18] sm:$0xff]   ;;  %v261_v33 = vand.u32 127, %v260_v31 }
  0x28   :  { %325 = vmatpush3.bf16.msra.mxu0 %v360_v1  ;;  %333 = vmatpush3.bf16.msra.mxu1 %v362_v4  ;;  %v367_v10 = vld [vmem:[#allocation7 + $0x10] sm:$0xff]   ;;  %v368_v11 = vld [vmem:[#allocation7 + $0x8] sm:$0xff]   ;;  %v369_v12 = vld [vmem:[#allocation7] sm:$0xff]  }
  0x29   :  { %326 = vmatprep.subr.bf16.mxu0 %v465_v0  ;;  %334 = vmatprep.subr.bf16.mxu1 %v465_v0  ;;  %v299_v13 = vld [vmem:[%s518_s2] ss:$0 sm:$0xff]  ;;  %vm262_vm2 = vcmp.ge.s32.totalorder %v261_v33, 16  ;;  %vm263_vm3 = vcmp.lt.s32.totalorder %v261_v33, 32  ;;  %s467_s2 = smov [#allocation8]  }
  0x2a   :  { %v311_v21 = vld [vmem:[%s520_s4] ss:$0 sm:$0xff]  ;;  %s289_s4 = sshll.u32 %s467_s2, 4  ;;  %vm264_vm4 = vmand %vm262_vm2, %vm263_vm3  ;;  %s290_s4 = int_to_ptr.vmem [resolvable:$true] %s289_s4 }
  0x2b   :  { %s434_s11 = scalar_lea.vmem %s290_s4, 128  ;;  %p439_p2 = scmp.lt.s32.totalorder %s290_s4, %s290_s4 }
  0x2c   :  { %327 = vmatpush3.bf16.msra.mxu0 %v361_v2  ;;  %335 = vmatpush3.bf16.msra.mxu1 %v363_v6  ;;  %p435_p1 = scmp.ne.s32.totalorder %s290_s4, %s434_s11  ;;  %p440_p3 = scmp.lt.s32.totalorder %s434_s11, %s434_s11 }
  0x2d   :  { %336 = vmatprep.subr.bf16.mxu1 %v465_v0 }
  0x2e   :  { %p441_p4 = por %p440_p3, %p439_p2 }
  0x2f   :  { %329 = vmatmul.mubr.msk.bf16.vlgmr.msra.gmra.mxu0 %vm86_vm1, %v62_v5 }
  0x30   :  { %337 = vmatpush3.bf16.msra.mxu1 %v364_v7  ;;  %p442_p5 = pnand %p441_p4, %p435_p1 }
  0x31   :  { %338 = vmatprep.subr.bf16.mxu1 %v465_v0 }
  0x34   :  { %339 = vmatpush3.bf16.msra.mxu1 %v365_v8 }
  0x35   :  { %340 = vmatprep.subr.bf16.mxu1 %v465_v0 }
  0x38   :  { %341 = vmatpush3.bf16.msra.mxu1 %v366_v9 }
  0x39   :  { %342 = vmatprep.subr.bf16.mxu1 %v465_v0 }
  0x3c   :  { %343 = vmatpush3.bf16.msra.mxu1 %v367_v10 }
  0x3d   :  { %344 = vmatprep.subr.bf16.mxu1 %v465_v0 }
  0x40   :  { %345 = vmatpush3.bf16.msra.mxu1 %v368_v11 }
  0x41   :  { %346 = vmatprep.subr.bf16.mxu1 %v465_v0 }
  0x44   :  { %347 = vmatpush3.bf16.msra.mxu1 %v369_v12 }
  0xef   :  { %v124_v14 = vpop.f32.mrf.mxu0 }
  0xf0   :  { %v125_v15 = vadd.f32 %v299_v13, %v124_v14 }
  0xf1   :  { %v330_v16 = vpop.f32.mrf.mxu0 }
  0xf2   :  { %v130_v17 = vmax.f32 %v125_v15, 0.0 }
  0xf3   :  { %v127_v18 = vpop.f32.mrf.mxu0 }
  0xf4   :  { %v131_v19 = vpack.c.bf16 %v130_v17, %v130_v17 }
  0xf5   :  { %v331_v20 = vpop.f32.mrf.mxu0 }
  0xf6   :  { %349 = vmatmul.mubr.bf16.vlgmr.msra.gmra.mxu1 %v131_v19 }
 0x1b6   :  { %v230_v22 = vpop.f32.mrf.mxu1 }
 0x1b7   :  { %v259_v23 = vadd.f32 %v311_v21, %v230_v22 }
 0x1b8   :  { %v350_v24 = vpop.f32.mrf.mxu1 }
 0x1b9   :  { %v266_v25 = vmin.f32 %v259_v23, 20.0  ;;  %vm265_vm6 = vcmp.gt.f32.partialorder %v259_v23, 20.0 }
 0x1ba   :  { %v233_v26 = vpop.f32.mrf.mxu1 }
 0x1bb   :  { %v267_v27 = vmul.f32 1.442695, %v266_v25 }
 0x1bc   :  { %v351_v28 = vpop.f32.mrf.mxu1 }
 0x1bd   :  { %370 = vpow2.f32 %v267_v27 }
 0x1ca   :  { %v371_v29 = vpop.eup %370 }
 0x1cb   :  { %v269_v30 = vadd.f32 1.0, %v371_v29  ;;  %v272_v32 = vmul.f32 -0.5, %v371_v29  ;;  %v275_v35 = vand.u32 2147483647, %v371_v29 }
 0x1cd   :  { %372 = vlog2.f32 %v269_v30  ;;  %v273_v34 = vadd.f32 1.0, %v272_v32  ;;  %vm276_vm5 = vcmp.lt.f32.partialorder %v275_v35, 0.0004427343 }
 0x1cf   :  { %v274_v38 = vmul.f32 %v371_v29, %v273_v34 }
 0x1da   :  { %v373_v36 = vpop.eup %372 }
 0x1db   :  { %v271_v37 = vmul.f32 0.6931472, %v373_v36 }
 0x1dd   :  { %v277_v39 = vsel %vm276_vm5, %v274_v38, %v271_v37 }
 0x1de   :  { %v278_v40 = vsel %vm265_vm6, %v259_v23, %v277_v39 }
 0x1df   :  { %v281_v41 = vsel %vm264_vm4, %v278_v40, %v259_v23 }
 0x1e0   :  { %282 = vst [vmem:[#allocation8] sm:$0xff] %v281_v41 }
 0x1e1   :  { %445 = shalt.err (!%p442_p5)
}
 0x1e2   :  { %292 = dma.vmem_to_hbm [thread:$0]  %s290_s4, 128, %s521_s5, [#allocation4]  }
 0x1e3   :  { %458 = dma.done.wait [#allocation4], 128  }
 0x1e4   :  { %459 = vsyncadd [#allocation4], 4294967168 }
 0x1e5   :  { %296 = vsyncpa [#allocation3], 1 }
 0x1e6   :  { %297 = vsyncpa [#allocation6], 1 }
 0x1e7   :  { %298 = vsyncpa [#allocation4], 1 }

</bundles_post_ra>
